<compile_context>
chip_gen: v5e
topology: v5e:2x2
jax: 0.10.0
libtpu: 0.0.40
codegen_flags: <defaults>
</compile_context>

<pallas_src>
import jax
import jax.numpy as jnp
from jax.experimental import pallas as pl
from jax.experimental.pallas import tpu as pltpu

_LANE = 128    # vreg lane width


def _round_up(v, m):
    return ((v + m - 1) // m) * m


def _pad2d(a, rows, cols):
    r, c = a.shape
    return jnp.pad(a, ((0, rows - r), (0, cols - c)))


def fused_encoder_kernel(x_ref, adj_ref, w1_ref, b1_ref, w2_ref, b2_ref, o_ref):
    """Both GraphConvolution layers fused; h stays in registers/VMEM values."""
    adj = adj_ref[...]                                   # [Np, Np] bf16, loaded once

    # ---- gc1: h = relu(adj @ (x @ W1) + b1) ----
    s1 = jnp.dot(x_ref[...], w1_ref[...],                # [Np, Hp], f32 accumulation
                 preferred_element_type=jnp.float32)
    h = jnp.dot(adj, s1.astype(jnp.bfloat16),
                preferred_element_type=jnp.float32)
    h = jnp.maximum(h + b1_ref[...], 0.0)                # bias + ReLU in f32 (VPU)

    # F.dropout with training=False is the identity.
    # TODO(synk): training-mode dropout would use pltpu.prng_seed +
    # pltpu.stateful_bernoulli on h here.
    h_bf = h.astype(jnp.bfloat16)                        # value only — no scratch store

    # ---- gc2: y = relu(adj @ (h @ W2) + b2) ----
    s2 = jnp.dot(h_bf, w2_ref[...],
                 preferred_element_type=jnp.float32)
    y = jnp.dot(adj, s2.astype(jnp.bfloat16),
                preferred_element_type=jnp.float32)
    # Output kept f32 to match the PyTorch module; switch o_ref dtype to bf16
    # if the downstream consumer tolerates it (halves the output writeback).
    o_ref[...] = jnp.maximum(y + b2_ref[...], 0.0).astype(o_ref.dtype)


def preprocess_encoder(adj, params):
    """One-time packing: pad to lane-dense shapes and cast matmul operands to bf16.

    adj and the weights are static across forward calls (GCN preprocessing /
    trained parameters), so pad+cast is hoisted out of the per-call wrapper.
    """
    n = adj.shape[0]
    fin, nhid = params["w1"].shape

    n_p = _round_up(max(n, _LANE), _LANE)       # adj's lane / MXU-K axis: 128-aligned
    fin_p = _round_up(max(fin, _LANE), _LANE)
    hid_p = _round_up(max(nhid, _LANE), _LANE)

    bf16 = jnp.bfloat16
    return {
        "adj": _pad2d(adj, n_p, n_p).astype(bf16),
        "w1": _pad2d(params["w1"], fin_p, hid_p).astype(bf16),
        "w2": _pad2d(params["w2"], hid_p, hid_p).astype(bf16),
        "b1": jnp.pad(params["b1"], (0, hid_p - nhid)).reshape(1, hid_p).astype(jnp.float32),
        "b2": jnp.pad(params["b2"], (0, hid_p - nhid)).reshape(1, hid_p).astype(jnp.float32),
        "dims": (n, fin, nhid, n_p, fin_p, hid_p),
    }


def _vmem_budget_bytes(n_p, fin_p, hid_p):
    """Scoped-VMEM request sized to the actual footprint (+ headroom)."""
    bf, f32 = 2, 4
    inputs = (n_p * fin_p + n_p * n_p + fin_p * hid_p + hid_p * hid_p) * bf \
             + 2 * hid_p * f32
    output = n_p * hid_p * f32
    # live intermediates: s1/h/s2 in f32 plus bf16 copies fed to the MXU
    interm = 3 * n_p * hid_p * f32 + 3 * n_p * hid_p * bf
    total = inputs + output + interm
    budget = int(total * 1.25) + (1 << 20)      # ~25% headroom + 1 MiB slack
    # TODO(synk): graphs needing more than ~48 MiB must go through the tiled
    # grid path (v7x has only 64 MiB VMEM per TensorCore).
    return min(max(budget, 4 << 20), 48 << 20)


def encoder_forward(x, packed, dropout_p=0.5, training=False):
    """Encoder.forward: relu(gc1) -> dropout -> relu(gc2), one fused pallas_call."""
    if training and dropout_p > 0.0:
        # TODO(synk): training-mode dropout not implemented (eval-mode identity only).
        raise NotImplementedError("training-mode dropout not implemented")

    n, fin, nhid, n_p, fin_p, hid_p = packed["dims"]
    assert x.shape == (n, fin)

    x_p = _pad2d(x, n_p, fin_p).astype(jnp.bfloat16)

    y_p = pl.pallas_call(
        fused_encoder_kernel,
        out_shape=jax.ShapeDtypeStruct((n_p, hid_p), jnp.float32),
        in_specs=[pl.BlockSpec(memory_space=pltpu.MemorySpace.VMEM)
                  for _ in range(6)],
        out_specs=pl.BlockSpec(memory_space=pltpu.MemorySpace.VMEM),
        compiler_params=pltpu.CompilerParams(
            vmem_limit_bytes=_vmem_budget_bytes(n_p, fin_p, hid_p)),
    )(x_p, packed["adj"], packed["w1"], packed["b1"], packed["w2"], packed["b2"])

    return y_p[:n, :nhid]


def init_params(key, nfeat, nhid):
    k1, k2, k3, k4 = jax.random.split(key, 4)
    # GraphConvolution typically uses uniform(-1/sqrt(fout), 1/sqrt(fout)) init.
    s1 = 1.0 / jnp.sqrt(nhid)
    return {
        "w1": jax.random.uniform(k1, (nfeat, nhid), jnp.float32, -s1, s1),
        "b1": jax.random.uniform(k2, (nhid,), jnp.float32, -s1, s1),
        "w2": jax.random.uniform(k3, (nhid, nhid), jnp.float32, -s1, s1),
        "b2": jax.random.uniform(k4, (nhid,), jnp.float32, -s1, s1),
    }


if __name__ == "__main__":
    key = jax.random.PRNGKey(0)
    kx, ka, kp = jax.random.split(key, 3)

    N, NFEAT, NHID = 8, 16, 32          # small graph: 8 nodes, 16 in-features, 32 hidden
    x = jax.random.normal(kx, (N, NFEAT), jnp.float32)

    # Symmetric row-normalized adjacency with self-loops (typical GCN preprocessing).
    a = (jax.random.uniform(ka, (N, N)) > 0.7).astype(jnp.float32)
    a = jnp.maximum(a, a.T) + jnp.eye(N, dtype=jnp.float32)
    deg = jnp.sum(a, axis=1, keepdims=True)
    adj = a / deg

    params = init_params(kp, NFEAT, NHID)

    packed = preprocess_encoder(adj, params)            # one-time pad + bf16 cast
    out = encoder_forward(x, packed, dropout_p=0.5, training=False)
    out = jax.block_until_ready(out)
    assert out.shape == (N, NHID)

    # Tight reference: f32 math on the same bf16-rounded operands the kernel sees.
    # Note: s1/s2 are re-rounded to bf16 between matmuls (double rounding); this
    # matches the kernel exactly and drifts slightly from pure f32 as N grows.
    def _bf(v):
        return v.astype(jnp.bfloat16).astype(jnp.float32)

    hp = jax.lax.Precision.HIGHEST
    s1 = jnp.dot(_bf(x), _bf(params["w1"]), precision=hp)
    h_ref = jnp.maximum(jnp.dot(_bf(adj), _bf(s1), precision=hp) + params["b1"], 0.0)
    s2 = jnp.dot(_bf(h_ref), _bf(params["w2"]), precision=hp)
    ref_bf = jnp.maximum(jnp.dot(_bf(adj), _bf(s2), precision=hp) + params["b2"], 0.0)
    assert jnp.allclose(out, ref_bf, atol=2e-3, rtol=2e-3), \
        float(jnp.max(jnp.abs(out - ref_bf)))

    # Loose sanity check vs pure-f32 reference (bf16 matmul inputs => small drift).
    ref32 = jnp.maximum(adj @ (x @ params["w1"]) + params["b1"], 0.0)
    ref32 = jnp.maximum(adj @ (ref32 @ params["w2"]) + params["b2"], 0.0)
    assert jnp.allclose(out, ref32, atol=5e-2, rtol=5e-2)

    print("KERNEL_OK")
</pallas_src>

<mosaic_0001>
module attributes {stable_mosaic.version = 11 : i64} {
  func.func @fused_encoder_kernel(%arg0: memref<128x128xbf16, #tpu.memory_space<vmem>>, %arg1: memref<128x128xbf16, #tpu.memory_space<vmem>>, %arg2: memref<128x128xbf16, #tpu.memory_space<vmem>>, %arg3: memref<1x128xf32, #tpu.memory_space<vmem>>, %arg4: memref<128x128xbf16, #tpu.memory_space<vmem>>, %arg5: memref<1x128xf32, #tpu.memory_space<vmem>>, %arg6: memref<128x128xf32, #tpu.memory_space<vmem>>) attributes {dimension_semantics = [], scalar_prefetch = 0 : i64, scratch_operands = 0 : i64, tpu.core_type = #tpu.core_type<tc>} {
    %c0 = arith.constant 0 : index
    %c0_0 = arith.constant 0 : index
    %0 = vector.load %arg1[%c0, %c0_0] : memref<128x128xbf16, #tpu.memory_space<vmem>>, vector<128x128xbf16>
    %c0_1 = arith.constant 0 : index
    %c0_2 = arith.constant 0 : index
    %1 = vector.load %arg0[%c0_1, %c0_2] : memref<128x128xbf16, #tpu.memory_space<vmem>>, vector<128x128xbf16>
    %c0_3 = arith.constant 0 : index
    %c0_4 = arith.constant 0 : index
    %2 = vector.load %arg2[%c0_3, %c0_4] : memref<128x128xbf16, #tpu.memory_space<vmem>>, vector<128x128xbf16>
    %cst = arith.constant dense<0.000000e+00> : vector<128x128xf32>
    %3 = tpu.matmul %1, %2, %cst {dimension_numbers = #tpu.dot_dimension_numbers<[1], [0], [0], [1], [0, 0, 1, 1], [], []>} : vector<128x128xbf16>, vector<128x128xbf16>, vector<128x128xf32> -> vector<128x128xf32>
    %4 = arith.truncf %3 : vector<128x128xf32> to vector<128x128xbf16>
    %cst_5 = arith.constant dense<0.000000e+00> : vector<128x128xf32>
    %5 = tpu.matmul %0, %4, %cst_5 {dimension_numbers = #tpu.dot_dimension_numbers<[1], [0], [0], [1], [0, 0, 1, 1], [], []>} : vector<128x128xbf16>, vector<128x128xbf16>, vector<128x128xf32> -> vector<128x128xf32>
    %c0_6 = arith.constant 0 : index
    %c0_7 = arith.constant 0 : index
    %6 = vector.load %arg3[%c0_6, %c0_7] : memref<1x128xf32, #tpu.memory_space<vmem>>, vector<1x128xf32>
    %7 = vector.broadcast %6 : vector<1x128xf32> to vector<128x128xf32>
    %8 = arith.addf %5, %7 : vector<128x128xf32>
    %cst_8 = arith.constant 0.000000e+00 : f32
    %9 = vector.broadcast %cst_8 : f32 to vector<128x128xf32>
    %10 = arith.maximumf %8, %9 : vector<128x128xf32>
    %11 = arith.truncf %10 : vector<128x128xf32> to vector<128x128xbf16>
    %c0_9 = arith.constant 0 : index
    %c0_10 = arith.constant 0 : index
    %12 = vector.load %arg4[%c0_9, %c0_10] : memref<128x128xbf16, #tpu.memory_space<vmem>>, vector<128x128xbf16>
    %cst_11 = arith.constant dense<0.000000e+00> : vector<128x128xf32>
    %13 = tpu.matmul %11, %12, %cst_11 {dimension_numbers = #tpu.dot_dimension_numbers<[1], [0], [0], [1], [0, 0, 1, 1], [], []>} : vector<128x128xbf16>, vector<128x128xbf16>, vector<128x128xf32> -> vector<128x128xf32>
    %14 = arith.truncf %13 : vector<128x128xf32> to vector<128x128xbf16>
    %cst_12 = arith.constant dense<0.000000e+00> : vector<128x128xf32>
    %15 = tpu.matmul %0, %14, %cst_12 {dimension_numbers = #tpu.dot_dimension_numbers<[1], [0], [0], [1], [0, 0, 1, 1], [], []>} : vector<128x128xbf16>, vector<128x128xbf16>, vector<128x128xf32> -> vector<128x128xf32>
    %c0_13 = arith.constant 0 : index
    %c0_14 = arith.constant 0 : index
    %16 = vector.load %arg5[%c0_13, %c0_14] : memref<1x128xf32, #tpu.memory_space<vmem>>, vector<1x128xf32>
    %17 = vector.broadcast %16 : vector<1x128xf32> to vector<128x128xf32>
    %18 = arith.addf %15, %17 : vector<128x128xf32>
    %cst_15 = arith.constant 0.000000e+00 : f32
    %19 = vector.broadcast %cst_15 : f32 to vector<128x128xf32>
    %20 = arith.maximumf %18, %19 : vector<128x128xf32>
    %c0_16 = arith.constant 0 : index
    %c0_17 = arith.constant 0 : index
    %21 = vector.load %arg6[%c0_16, %c0_17] : memref<128x128xf32, #tpu.memory_space<vmem>>, vector<128x128xf32>
    tpu.vector_store %arg6[%c0_16, %c0_17], %20 {strides = array<i32>} : memref<128x128xf32, #tpu.memory_space<vmem>>, vector<128x128xf32>,
    return
  }
}

</mosaic_0001>

<bundles_post_ra>
// kernel: tpu_custom_call.1
= control target key start
LH: loop header
LB: loop body
LE: loop exit
PB: predicated region body
PF: predicated region fallthrough
CT: control target
= control target key end

     0   :  { %11 = vsyncpa [#allocation3], 0  ;;  %s1054_s0 = inlined_call_operand.hbm [shape: bf16[128,128], index: 0, kind: input, shape index: {}]   ;;  %s1055_s1 = inlined_call_operand.hbm [shape: bf16[128,128], index: 1, kind: input, shape index: {}]   ;;  %s1056_s2 = inlined_call_operand.hbm [shape: bf16[128,128], index: 2, kind: input, shape index: {}]   ;;  %s1057_s3 = inlined_call_operand.vmem [shape: f32[1,128], index: 3, kind: input, shape index: {}]   ;;  %s1058_s4 = inlined_call_operand.hbm [shape: bf16[128,128], index: 4, kind: input, shape index: {}]   ;;  %s1059_s5 = inlined_call_operand.vmem [shape: f32[1,128], index: 5, kind: input, shape index: {}]   ;;  %s1060_s6 = inlined_call_operand.hbm [shape: f32[128,128], index: 6, kind: output, shape index: {}]  }
   0x1   :  { %12 = vsyncpa [#allocation6], 0 }
   0x2   :  { %13 = vsyncpa [#allocation9], 0 }
   0x3   :  { %14 = vsyncpa [#allocation4], 0  ;;  %s32_s23 = sshll.u32 %s1055_s1, 4  ;;  %s939_s24 = smov [#allocation5]   ;;  %s33_s23 = int_to_ptr.hbm [resolvable:$true] %s32_s23 }
   0x4   :  { %s34_s25 = sshll.u32 %s939_s24, 4  ;;  %s19_s28 = sshll.u32 %s1054_s0, 4  ;;  %s35_s25 = int_to_ptr.vmem [resolvable:$true] %s34_s25  ;;  %s20_s28 = int_to_ptr.hbm [resolvable:$true] %s19_s28 }
   0x5   :  { %s940_s29 = smov 64   ;;  %s941_s30 = smov 4  }
   0x6   :  { %40 = dma.hbm_to_vmem [thread:$0]  %s33_s23, 1024, %s35_s25, [#allocation6], %s940_s29, %s940_s29, %s941_s30  }
   0x7   :  { %s942_s7 = smov [#allocation2]   ;;  %s45_s11 = sshll.u32 %s1056_s2, 4  ;;  %s46_s11 = int_to_ptr.hbm [resolvable:$true] %s45_s11 }
   0x8   :  { %s21_s8 = sshll.u32 %s942_s7, 4  ;;  %s60_s13 = sshll.u32 %s1058_s4, 4  ;;  %s22_s8 = int_to_ptr.vmem [resolvable:$true] %s21_s8  ;;  %s61_s13 = int_to_ptr.hbm [resolvable:$true] %s60_s13 }
   0x9   :  { %27 = dma.hbm_to_vmem [thread:$0]  %s20_s28, 1024, %s22_s8, [#allocation3], %s940_s29, %s940_s29, %s941_s30  }
   0xa   :  { %s943_s14 = smov [#allocation7]   ;;  %s944_s0 = smov [#allocation8]  }
   0xb   :  { %s47_s15 = sshll.u32 %s943_s14, 4  ;;  %s62_s16 = sshll.u32 %s944_s0, 4  ;;  %s48_s15 = int_to_ptr.vmem [resolvable:$true] %s47_s15  ;;  %s63_s16 = int_to_ptr.vmem [resolvable:$true] %s62_s16 }
   0xc   :  { %53 = dma.hbm_to_vmem [thread:$0]  %s46_s11, 1024, %s48_s15, [#allocation6], %s940_s29, %s940_s29, %s941_s30  }
   0xd   :  { %68 = dma.hbm_to_vmem [thread:$0]  %s61_s13, 1024, %s63_s16, [#allocation9], %s940_s29, %s940_s29, %s941_s30  }
   0xe   :  { %931 = dma.done.wait [#allocation3], 1024  }
   0xf   :  { %932 = vsyncadd [#allocation3], 4294966272 }
  0x10   :  { %933 = dma.done.wait [#allocation6], 2048  }
  0x11   :  { %934 = vsyncadd [#allocation6], 4294965248 }
  0x12   :  { %935 = dma.done.wait [#allocation9], 1024  }
  0x13   :  { %936 = vsyncadd [#allocation9], 4294966272  ;;  %v791_v0 = vld [vmem:[#allocation7 + $0x38] sm:$0xff]  ;;  %v790_v1 = vld [vmem:[#allocation7 + $0x30] sm:$0xff]  ;;  %s625_s21 = sshll.u32 %s1060_s6, 4  ;;  %s946_s22 = smov 128   ;;  %s626_s21 = int_to_ptr.hbm [resolvable:$true] %s625_s21 }
  0x14   :  { %231 = vmatpush.bf16.msra.mxu0 %v791_v0  ;;  %v789_v2 = vld [vmem:[#allocation7 + $0x28] sm:$0xff]  ;;  %v788_v3 = vld [vmem:[#allocation7 + $0x20] sm:$0xff]  ;;  %v787_v4 = vld [vmem:[#allocation7 + $0x18] sm:$0xff]  ;;  %s947_s23 = smov 8  }
  0x15   :  { %v786_v5 = vld [vmem:[#allocation7 + $0x10] sm:$0xff]  ;;  %v785_v6 = vld [vmem:[#allocation7 + $0x8] sm:$0xff]  ;;  %v784_v7 = vld [vmem:[#allocation7] sm:$0xff] }
  0x16   :  { %v776_v8 = vld [vmem:[#allocation2] sm:$0xff]  ;;  %v777_v9 = vld [vmem:[#allocation2 + $0x8] sm:$0xff]  ;;  %v778_v10 = vld [vmem:[#allocation2 + $0x10] sm:$0xff] }
  0x17   :  { %v779_v11 = vld [vmem:[#allocation2 + $0x18] sm:$0xff]  ;;  %v780_v12 = vld [vmem:[#allocation2 + $0x20] sm:$0xff]  ;;  %v781_v13 = vld [vmem:[#allocation2 + $0x28] sm:$0xff] }
  0x18   :  { %232 = vmatpush.bf16.msra.mxu0 %v790_v1  ;;  %v782_v14 = vld [vmem:[#allocation2 + $0x30] sm:$0xff]  ;;  %v783_v15 = vld [vmem:[#allocation2 + $0x38] sm:$0xff]  ;;  %v995_v40 = vld [vmem:[#allocation5] sm:$0xff] }
  0x19   :  { %v998_v41 = vld [vmem:[#allocation5 + $0x8] sm:$0xff]  ;;  %v1001_v42 = vld [vmem:[#allocation5 + $0x10] sm:$0xff]  ;;  %v1004_v43 = vld [vmem:[#allocation5 + $0x18] sm:$0xff] }
  0x1a   :  { %v1007_v44 = vld [vmem:[#allocation5 + $0x20] sm:$0xff]  ;;  %v799_v45 = vld [vmem:[#allocation8 + $0x38] sm:$0xff]  ;;  %v1010_v46 = vld [vmem:[#allocation5 + $0x28] sm:$0xff] }
  0x1b   :  { %477 = vmatpush.bf16.msra.mxu2 %v799_v45  ;;  %v798_v47 = vld [vmem:[#allocation8 + $0x30] sm:$0xff]  ;;  %v797_v48 = vld [vmem:[#allocation8 + $0x28] sm:$0xff]  ;;  %v796_v49 = vld [vmem:[#allocation8 + $0x20] sm:$0xff] }
  0x1c   :  { %233 = vmatpush.bf16.msra.mxu0 %v789_v2  ;;  %v795_v50 = vld [vmem:[#allocation8 + $0x18] sm:$0xff]  ;;  %v1013_v51 = vld [vmem:[#allocation5 + $0x30] sm:$0xff]  ;;  %v793_v53 = vld [vmem:[#allocation8 + $0x8] sm:$0xff] }
  0x1d   :  { %v794_v52 = vld [vmem:[#allocation8 + $0x10] sm:$0xff]  ;;  %v792_v54 = vld [vmem:[#allocation8] sm:$0xff]  ;;  %v1016_v55 = vld [vmem:[#allocation5 + $0x38] sm:$0xff] }
  0x1e   :  { %v809_v57 = vld [vmem:[%s1057_s3] ss:$0 sm:$0xff] }
  0x1f   :  { %478 = vmatpush.bf16.msra.mxu2 %v798_v47 }
  0x20   :  { %234 = vmatpush.bf16.msra.mxu0 %v788_v3 }
  0x23   :  { %479 = vmatpush.bf16.msra.mxu2 %v797_v48 }
  0x24   :  { %235 = vmatpush.bf16.msra.mxu0 %v787_v4 }
  0x27   :  { %480 = vmatpush.bf16.msra.mxu2 %v796_v49 }
  0x28   :  { %236 = vmatpush.bf16.msra.mxu0 %v786_v5 }
  0x2b   :  { %481 = vmatpush.bf16.msra.mxu2 %v795_v50 }
  0x2c   :  { %237 = vmatpush.bf16.msra.mxu0 %v785_v6 }
  0x2f   :  { %482 = vmatpush.bf16.msra.mxu2 %v794_v52 }
  0x30   :  { %238 = vmatpush.bf16.msra.mxu0 %v784_v7 }
  0x33   :  { %239 = vmatmul.bf16.vlgmr.msra.gmra.mxu0 %v776_v8  ;;  %483 = vmatpush.bf16.msra.mxu2 %v793_v53 }
  0x37   :  { %484 = vmatpush.bf16.msra.mxu2 %v792_v54 }
  0x43   :  { %244 = vmatmul.bf16.gmra.mxu0 %v777_v9 }
  0x53   :  { %249 = vmatmul.bf16.gmra.mxu0 %v778_v10 }
  0x63   :  { %254 = vmatmul.bf16.gmra.mxu0 %v779_v11 }
  0x73   :  { %259 = vmatmul.bf16.gmra.mxu0 %v780_v12 }
  0x83   :  { %264 = vmatmul.bf16.gmra.mxu0 %v781_v13 }
  0x93   :  { %269 = vmatmul.bf16.gmra.mxu0 %v782_v14 }
  0xa3   :  { %274 = vmatmul.bf16.gmra.mxu0 %v783_v15 }
  0xb0   :  { %v240_v16 = vpop.f32.mrf.mxu0 }
  0xb8   :  { %v242_v17 = vpop.f32.mrf.mxu0 }
  0xb9   :  { %v280_v18 = vpack.c.bf16 %v242_v17, %v240_v16 }
  0xc0   :  { %v245_v19 = vpop.f32.mrf.mxu0 }
  0xc8   :  { %v247_v20 = vpop.f32.mrf.mxu0 }
  0xc9   :  { %v281_v21 = vpack.c.bf16 %v247_v20, %v245_v19 }
  0xd0   :  { %v250_v22 = vpop.f32.mrf.mxu0 }
  0xd8   :  { %v252_v23 = vpop.f32.mrf.mxu0 }
  0xd9   :  { %v282_v24 = vpack.c.bf16 %v252_v23, %v250_v22 }
  0xe0   :  { %v255_v25 = vpop.f32.mrf.mxu0 }
  0xe8   :  { %v257_v26 = vpop.f32.mrf.mxu0 }
  0xe9   :  { %v283_v27 = vpack.c.bf16 %v257_v26, %v255_v25 }
  0xf0   :  { %v260_v28 = vpop.f32.mrf.mxu0 }
  0xf8   :  { %v262_v29 = vpop.f32.mrf.mxu0 }
  0xf9   :  { %v284_v39 = vpack.c.bf16 %v262_v29, %v260_v28 }
 0x100   :  { %v265_v30 = vpop.f32.mrf.mxu0 }
 0x108   :  { %v267_v31 = vpop.f32.mrf.mxu0 }
 0x109   :  { %v285_v38 = vpack.c.bf16 %v267_v31, %v265_v30 }
 0x110   :  { %v270_v32 = vpop.f32.mrf.mxu0 }
 0x118   :  { %v272_v33 = vpop.f32.mrf.mxu0 }
 0x119   :  { %v286_v37 = vpack.c.bf16 %v272_v33, %v270_v32 }
 0x120   :  { %v275_v34 = vpop.f32.mrf.mxu0 }
 0x128   :  { %v277_v35 = vpop.f32.mrf.mxu0 }
 0x129   :  { %v287_v36 = vpack.c.bf16 %v277_v35, %v275_v34 }
 0x12b   :  { %340 = vmatpush.bf16.msra.mxu1 %v287_v36 }
 0x12f   :  { %341 = vmatpush.bf16.msra.mxu1 %v286_v37 }
 0x133   :  { %342 = vmatpush.bf16.msra.mxu1 %v285_v38 }
 0x137   :  { %343 = vmatpush.bf16.msra.mxu1 %v284_v39 }
 0x13b   :  { %344 = vmatpush.bf16.msra.mxu1 %v283_v27 }
 0x13f   :  { %345 = vmatpush.bf16.msra.mxu1 %v282_v24 }
 0x143   :  { %346 = vmatpush.bf16.msra.mxu1 %v281_v21 }
 0x147   :  { %347 = vmatpush.bf16.msra.mxu1 %v280_v18 }
 0x14a   :  { %348 = vmatmul.bf16.vlgmr.msra.gmra.mxu1 %v995_v40 }
 0x15a   :  { %353 = vmatmul.bf16.gmra.mxu1 %v998_v41 }
 0x16a   :  { %358 = vmatmul.bf16.gmra.mxu1 %v1001_v42 }
 0x17a   :  { %363 = vmatmul.bf16.gmra.mxu1 %v1004_v43 }
 0x18a   :  { %368 = vmatmul.bf16.gmra.mxu1 %v1007_v44 }
 0x19a   :  { %373 = vmatmul.bf16.gmra.mxu1 %v1010_v46 }
 0x1aa   :  { %378 = vmatmul.bf16.gmra.mxu1 %v1013_v51 }
 0x1ba   :  { %383 = vmatmul.bf16.gmra.mxu1 %v1016_v55 }
 0x1c7   :  { %v349_v56 = vpop.f32.mrf.mxu1 }
 0x1c8   :  { %v350_v58 = vadd.f32 %v809_v57, %v349_v56 }
 0x1ca   :  { %v389_v61 = vmax.f32 %v350_v58, 0.0 }
 0x1cf   :  { %v351_v59 = vpop.f32.mrf.mxu1 }
 0x1d0   :  { %v352_v60 = vadd.f32 %v809_v57, %v351_v59 }
 0x1d2   :  { %v390_v62 = vmax.f32 %v352_v60, 0.0 }
 0x1d4   :  { %v405_v63 = vpack.c.bf16 %v390_v62, %v389_v61 }
 0x1d6   :  { %485 = vmatmul.bf16.vlgmr.msra.gmra.mxu2 %v405_v63 }
 0x1d7   :  { %v354_v0 = vpop.f32.mrf.mxu1 }
 0x1d8   :  { %v355_v1 = vadd.f32 %v809_v57, %v354_v0 }
 0x1da   :  { %v391_v4 = vmax.f32 %v355_v1, 0.0 }
 0x1df   :  { %v356_v2 = vpop.f32.mrf.mxu1 }
 0x1e0   :  { %v357_v3 = vadd.f32 %v809_v57, %v356_v2 }
 0x1e2   :  { %v392_v5 = vmax.f32 %v357_v3, 0.0 }
 0x1e4   :  { %v406_v6 = vpack.c.bf16 %v392_v5, %v391_v4 }
 0x1e6   :  { %490 = vmatmul.bf16.gmra.mxu2 %v406_v6 }
 0x1e7   :  { %v359_v7 = vpop.f32.mrf.mxu1 }
 0x1e8   :  { %v360_v8 = vadd.f32 %v809_v57, %v359_v7 }
 0x1ea   :  { %v393_v11 = vmax.f32 %v360_v8, 0.0 }
 0x1ef   :  { %v361_v9 = vpop.f32.mrf.mxu1 }
 0x1f0   :  { %v362_v10 = vadd.f32 %v809_v57, %v361_v9 }
 0x1f2   :  { %v394_v12 = vmax.f32 %v362_v10, 0.0 }
 0x1f4   :  { %v407_v13 = vpack.c.bf16 %v394_v12, %v393_v11 }
 0x1f6   :  { %495 = vmatmul.bf16.gmra.mxu2 %v407_v13 }
 0x1f7   :  { %v364_v14 = vpop.f32.mrf.mxu1 }
 0x1f8   :  { %v365_v15 = vadd.f32 %v809_v57, %v364_v14 }
 0x1fa   :  { %v395_v18 = vmax.f32 %v365_v15, 0.0 }
 0x1ff   :  { %v366_v16 = vpop.f32.mrf.mxu1 }
 0x200   :  { %v367_v17 = vadd.f32 %v809_v57, %v366_v16 }
 0x202   :  { %v396_v19 = vmax.f32 %v367_v17, 0.0  ;;  %v1033_v17 = vld [vmem:[%s1059_s5] ss:$0 sm:$0xff]  ;;  %s945_s5 = smov [#allocation10]  }
 0x203   :  { %s623_s18 = sshll.u32 %s945_s5, 4  ;;  %s624_s18 = int_to_ptr.vmem [resolvable:$true] %s623_s18 }
 0x204   :  { %v408_v20 = vpack.c.bf16 %v396_v19, %v395_v18 }
 0x206   :  { %500 = vmatmul.bf16.gmra.mxu2 %v408_v20 }
 0x207   :  { %v369_v21 = vpop.f32.mrf.mxu1 }
 0x208   :  { %v370_v22 = vadd.f32 %v809_v57, %v369_v21 }
 0x20a   :  { %v397_v25 = vmax.f32 %v370_v22, 0.0 }
 0x20f   :  { %v371_v23 = vpop.f32.mrf.mxu1 }
 0x210   :  { %v372_v24 = vadd.f32 %v809_v57, %v371_v23 }
 0x212   :  { %v398_v26 = vmax.f32 %v372_v24, 0.0 }
 0x214   :  { %v409_v27 = vpack.c.bf16 %v398_v26, %v397_v25 }
 0x216   :  { %505 = vmatmul.bf16.gmra.mxu2 %v409_v27 }
 0x217   :  { %v374_v28 = vpop.f32.mrf.mxu1 }
 0x218   :  { %v375_v29 = vadd.f32 %v809_v57, %v374_v28 }
 0x21a   :  { %v399_v32 = vmax.f32 %v375_v29, 0.0 }
 0x21f   :  { %v376_v30 = vpop.f32.mrf.mxu1 }
 0x220   :  { %v377_v31 = vadd.f32 %v809_v57, %v376_v30 }
 0x222   :  { %v400_v33 = vmax.f32 %v377_v31, 0.0 }
 0x224   :  { %v410_v34 = vpack.c.bf16 %v400_v33, %v399_v32 }
 0x226   :  { %510 = vmatmul.bf16.gmra.mxu2 %v410_v34 }
 0x227   :  { %v379_v35 = vpop.f32.mrf.mxu1 }
 0x228   :  { %v380_v36 = vadd.f32 %v809_v57, %v379_v35 }
 0x22a   :  { %v401_v39 = vmax.f32 %v380_v36, 0.0 }
 0x22f   :  { %v381_v37 = vpop.f32.mrf.mxu1 }
 0x230   :  { %v382_v38 = vadd.f32 %v809_v57, %v381_v37 }
 0x232   :  { %v402_v45 = vmax.f32 %v382_v38, 0.0 }
 0x234   :  { %v411_v47 = vpack.c.bf16 %v402_v45, %v401_v39 }
 0x236   :  { %515 = vmatmul.bf16.gmra.mxu2 %v411_v47 }
 0x237   :  { %v384_v48 = vpop.f32.mrf.mxu1 }
 0x238   :  { %v385_v49 = vadd.f32 %v809_v57, %v384_v48 }
 0x23a   :  { %v403_v53 = vmax.f32 %v385_v49, 0.0 }
 0x23f   :  { %v386_v50 = vpop.f32.mrf.mxu1 }
 0x240   :  { %v387_v52 = vadd.f32 %v809_v57, %v386_v50 }
 0x242   :  { %v404_v54 = vmax.f32 %v387_v52, 0.0 }
 0x244   :  { %v412_v56 = vpack.c.bf16 %v404_v54, %v403_v53 }
 0x246   :  { %520 = vmatmul.bf16.gmra.mxu2 %v412_v56 }
 0x259   :  { %v486_v58 = vpop.f32.mrf.mxu2 }
 0x261   :  { %v488_v59 = vpop.f32.mrf.mxu2 }
 0x262   :  { %v526_v60 = vpack.c.bf16 %v488_v59, %v486_v58 }
 0x269   :  { %v491_v61 = vpop.f32.mrf.mxu2 }
 0x271   :  { %v493_v62 = vpop.f32.mrf.mxu2 }
 0x272   :  { %v527_v63 = vpack.c.bf16 %v493_v62, %v491_v61 }
 0x279   :  { %v496_v0 = vpop.f32.mrf.mxu2 }
 0x281   :  { %v498_v1 = vpop.f32.mrf.mxu2 }
 0x282   :  { %v528_v2 = vpack.c.bf16 %v498_v1, %v496_v0 }
 0x289   :  { %v501_v3 = vpop.f32.mrf.mxu2 }
 0x291   :  { %v503_v4 = vpop.f32.mrf.mxu2 }
 0x292   :  { %v529_v5 = vpack.c.bf16 %v503_v4, %v501_v3 }
 0x299   :  { %v506_v6 = vpop.f32.mrf.mxu2 }
 0x2a1   :  { %v508_v7 = vpop.f32.mrf.mxu2 }
 0x2a2   :  { %v530_v16 = vpack.c.bf16 %v508_v7, %v506_v6 }
 0x2a9   :  { %v511_v8 = vpop.f32.mrf.mxu2 }
 0x2b1   :  { %v513_v57 = vpop.f32.mrf.mxu2 }
 0x2b2   :  { %v531_v15 = vpack.c.bf16 %v513_v57, %v511_v8 }
 0x2b9   :  { %v516_v9 = vpop.f32.mrf.mxu2 }
 0x2c1   :  { %v518_v10 = vpop.f32.mrf.mxu2 }
 0x2c2   :  { %v532_v14 = vpack.c.bf16 %v518_v10, %v516_v9 }
 0x2c9   :  { %v521_v11 = vpop.f32.mrf.mxu2 }
 0x2d1   :  { %v523_v12 = vpop.f32.mrf.mxu2 }
 0x2d2   :  { %v533_v13 = vpack.c.bf16 %v523_v12, %v521_v11 }
 0x2d4   :  { %538 = vmatpush.bf16.msra.mxu3 %v533_v13 }
 0x2d8   :  { %539 = vmatpush.bf16.msra.mxu3 %v532_v14 }
 0x2dc   :  { %540 = vmatpush.bf16.msra.mxu3 %v531_v15 }
 0x2e0   :  { %541 = vmatpush.bf16.msra.mxu3 %v530_v16 }
 0x2e4   :  { %542 = vmatpush.bf16.msra.mxu3 %v529_v5 }
 0x2e8   :  { %543 = vmatpush.bf16.msra.mxu3 %v528_v2 }
 0x2ec   :  { %544 = vmatpush.bf16.msra.mxu3 %v527_v63 }
 0x2f0   :  { %545 = vmatpush.bf16.msra.mxu3 %v526_v60 }
 0x2f3   :  { %546 = vmatmul.bf16.vlgmr.msra.gmra.mxu3 %v995_v40 }
 0x303   :  { %551 = vmatmul.bf16.gmra.mxu3 %v998_v41 }
 0x313   :  { %556 = vmatmul.bf16.gmra.mxu3 %v1001_v42 }
 0x323   :  { %561 = vmatmul.bf16.gmra.mxu3 %v1004_v43 }
 0x333   :  { %566 = vmatmul.bf16.gmra.mxu3 %v1007_v44 }
 0x343   :  { %571 = vmatmul.bf16.gmra.mxu3 %v1010_v46 }
 0x353   :  { %576 = vmatmul.bf16.gmra.mxu3 %v1013_v51 }
 0x363   :  { %581 = vmatmul.bf16.gmra.mxu3 %v1016_v55 }
 0x376   :  { %v547_v40 = vpop.f32.mrf.mxu3 }
 0x377   :  { %v548_v41 = vadd.f32 %v1033_v17, %v547_v40 }
 0x379   :  { %v587_v18 = vmax.f32 %v548_v41, 0.0 }
 0x37b   :  { %603 = vst [vmem:[#allocation10] sm:$0xff] %v587_v18 }
 0x37e   :  { %v549_v42 = vpop.f32.mrf.mxu3 }
 0x37f   :  { %v550_v43 = vadd.f32 %v1033_v17, %v549_v42 }
 0x381   :  { %v588_v44 = vmax.f32 %v550_v43, 0.0 }
 0x383   :  { %604 = vst [vmem:[#allocation10 + $0x8] sm:$0xff] %v588_v44 }
 0x386   :  { %v552_v46 = vpop.f32.mrf.mxu3 }
 0x387   :  { %v553_v51 = vadd.f32 %v1033_v17, %v552_v46 }
 0x389   :  { %v589_v19 = vmax.f32 %v553_v51, 0.0 }
 0x38b   :  { %605 = vst [vmem:[#allocation10 + $0x10] sm:$0xff] %v589_v19 }
 0x38e   :  { %v554_v55 = vpop.f32.mrf.mxu3 }
 0x38f   :  { %v555_v20 = vadd.f32 %v1033_v17, %v554_v55 }
 0x391   :  { %v590_v21 = vmax.f32 %v555_v20, 0.0 }
 0x393   :  { %606 = vst [vmem:[#allocation10 + $0x18] sm:$0xff] %v590_v21 }
 0x396   :  { %v557_v22 = vpop.f32.mrf.mxu3 }
 0x397   :  { %v558_v23 = vadd.f32 %v1033_v17, %v557_v22 }
 0x399   :  { %v591_v24 = vmax.f32 %v558_v23, 0.0 }
 0x39b   :  { %607 = vst [vmem:[#allocation10 + $0x20] sm:$0xff] %v591_v24 }
 0x39e   :  { %v559_v25 = vpop.f32.mrf.mxu3 }
 0x39f   :  { %v560_v26 = vadd.f32 %v1033_v17, %v559_v25 }
 0x3a1   :  { %v592_v27 = vmax.f32 %v560_v26, 0.0 }
 0x3a3   :  { %608 = vst [vmem:[#allocation10 + $0x28] sm:$0xff] %v592_v27 }
 0x3a6   :  { %v562_v28 = vpop.f32.mrf.mxu3 }
 0x3a7   :  { %v563_v29 = vadd.f32 %v1033_v17, %v562_v28 }
 0x3a9   :  { %v593_v30 = vmax.f32 %v563_v29, 0.0 }
 0x3ab   :  { %609 = vst [vmem:[#allocation10 + $0x30] sm:$0xff] %v593_v30 }
 0x3ae   :  { %v564_v31 = vpop.f32.mrf.mxu3 }
 0x3af   :  { %v565_v32 = vadd.f32 %v1033_v17, %v564_v31 }
 0x3b1   :  { %v594_v33 = vmax.f32 %v565_v32, 0.0 }
 0x3b3   :  { %610 = vst [vmem:[#allocation10 + $0x38] sm:$0xff] %v594_v33 }
 0x3b6   :  { %v567_v34 = vpop.f32.mrf.mxu3 }
 0x3b7   :  { %v568_v35 = vadd.f32 %v1033_v17, %v567_v34 }
 0x3b9   :  { %v595_v36 = vmax.f32 %v568_v35, 0.0 }
 0x3bb   :  { %611 = vst [vmem:[#allocation10 + $0x40] sm:$0xff] %v595_v36 }
 0x3be   :  { %v569_v37 = vpop.f32.mrf.mxu3 }
 0x3bf   :  { %v570_v38 = vadd.f32 %v1033_v17, %v569_v37 }
 0x3c1   :  { %v596_v39 = vmax.f32 %v570_v38, 0.0 }
 0x3c3   :  { %612 = vst [vmem:[#allocation10 + $0x48] sm:$0xff] %v596_v39 }
 0x3c6   :  { %v572_v45 = vpop.f32.mrf.mxu3 }
 0x3c7   :  { %v573_v47 = vadd.f32 %v1033_v17, %v572_v45 }
 0x3c9   :  { %v597_v48 = vmax.f32 %v573_v47, 0.0 }
 0x3cb   :  { %613 = vst [vmem:[#allocation10 + $0x50] sm:$0xff] %v597_v48 }
 0x3ce   :  { %v574_v49 = vpop.f32.mrf.mxu3 }
 0x3cf   :  { %v575_v50 = vadd.f32 %v1033_v17, %v574_v49 }
 0x3d1   :  { %v598_v52 = vmax.f32 %v575_v50, 0.0 }
 0x3d3   :  { %614 = vst [vmem:[#allocation10 + $0x58] sm:$0xff] %v598_v52 }
 0x3d6   :  { %v577_v53 = vpop.f32.mrf.mxu3 }
 0x3d7   :  { %v578_v54 = vadd.f32 %v1033_v17, %v577_v53 }
 0x3d9   :  { %v599_v56 = vmax.f32 %v578_v54, 0.0 }
 0x3db   :  { %615 = vst [vmem:[#allocation10 + $0x60] sm:$0xff] %v599_v56 }
 0x3de   :  { %v579_v58 = vpop.f32.mrf.mxu3 }
 0x3df   :  { %v580_v59 = vadd.f32 %v1033_v17, %v579_v58 }
 0x3e1   :  { %v600_v60 = vmax.f32 %v580_v59, 0.0 }
 0x3e3   :  { %616 = vst [vmem:[#allocation10 + $0x68] sm:$0xff] %v600_v60 }
 0x3e6   :  { %v582_v61 = vpop.f32.mrf.mxu3 }
 0x3e7   :  { %v583_v62 = vadd.f32 %v1033_v17, %v582_v61 }
 0x3e9   :  { %v601_v63 = vmax.f32 %v583_v62, 0.0 }
 0x3eb   :  { %617 = vst [vmem:[#allocation10 + $0x70] sm:$0xff] %v601_v63 }
 0x3ee   :  { %v584_v0 = vpop.f32.mrf.mxu3 }
 0x3ef   :  { %v585_v1 = vadd.f32 %v1033_v17, %v584_v0 }
 0x3f1   :  { %v602_v2 = vmax.f32 %v585_v1, 0.0 }
 0x3f3   :  { %618 = vst [vmem:[#allocation10 + $0x78] sm:$0xff] %v602_v2 }
 0x3f4   :  { %631 = dma.vmem_to_hbm [thread:$0]  %s624_s18, 2048, %s626_s21, [#allocation4], %s946_s22, %s946_s22, %s947_s23  }
 0x3f5   :  { %937 = dma.done.wait [#allocation4], 2048  }
 0x3f6   :  { %938 = vsyncadd [#allocation4], 4294965248 }
 0x3f7   :  { %636 = vsyncpa [#allocation3], 1 }
 0x3f8   :  { %637 = vsyncpa [#allocation6], 1 }
 0x3f9   :  { %638 = vsyncpa [#allocation9], 1 }
 0x3fa   :  { %639 = vsyncpa [#allocation4], 1 }

</bundles_post_ra>
